<compile_context>
chip_gen: v6e
topology: v6e:2x2x1
jax: 0.10.0
libtpu: 0.0.40
codegen_flags: <defaults>
</compile_context>

<pallas_src>
import jax
import jax.numpy as jnp
from jax import lax
from jax.experimental import pallas as pl
from jax.experimental.pallas import tpu as pltpu


def _round_up(x: int, m: int) -> int:
    return (x + m - 1) // m * m


_VMEM_LIMIT_CACHE = None


def _vmem_limit_bytes() -> int:
    """64 MiB on 128-MiB parts (v5e/v6e), 32 MiB on 64-MiB parts (v7x)."""
    global _VMEM_LIMIT_CACHE
    if _VMEM_LIMIT_CACHE is None:
        try:
            cap = int(pltpu.get_tpu_info().vmem_capacity_bytes)
        except Exception:
            cap = 128 * 1024 * 1024
        _VMEM_LIMIT_CACHE = min(64 * 1024 * 1024, max(cap // 2, 16 * 1024 * 1024))
    return _VMEM_LIMIT_CACHE


def _choose_tk(Kp: int, TM: int, Coutp: int, budget: int) -> int:
    """Largest TK (multiple of 128, dividing Kp) whose working set fits VMEM.

    Prefers TK == Kp so the bf16 weight tile stays VMEM-resident across all M
    tiles (one DMA total) and the K reduction needs no grid axis.
    """
    tk = Kp
    while tk >= 128:
        if Kp % tk == 0:
            need = (2 * TM * tk * 2        # double-buffered bf16 patch tiles
                    + 2 * tk * Coutp * 2   # double-buffered bf16 weight tiles
                    + TM * Coutp * 4       # f32 accumulator scratch
                    + 2 * TM * Coutp * 4)  # double-buffered outputs (upper bound)
            if need <= budget:
                return tk
        tk -= 128
    return 128


# ----------------------------- Pallas kernels ------------------------------

def _conv_stats_kernel(p_ref, w_ref, o_ref, sum_ref, sq_ref, acc_ref):
    """Tiled (M,K)x(K,Coutp) bf16 matmul + per-channel sum / sum-of-squares.

    Writes the conv result in bf16; BN statistics are taken from the f32
    accumulator so only the stored activation is rounded.
    """
    k = pl.program_id(1)

    @pl.when(k == 0)
    def _():
        acc_ref[...] = jnp.zeros_like(acc_ref)

    acc_ref[...] += jnp.dot(p_ref[...], w_ref[...],
                            preferred_element_type=jnp.float32)

    @pl.when(k == pl.num_programs(1) - 1)
    def _():
        res = acc_ref[...]
        o_ref[...] = res.astype(o_ref.dtype)              # bf16 writeback
        # Padded patch rows are all-zero (bias dropped) => contribute 0 here.
        s = jnp.sum(res, axis=0, keepdims=True)           # (1, Coutp)
        sq = jnp.sum(res * res, axis=0, keepdims=True)    # (1, Coutp)
        sum_ref[...] = jnp.broadcast_to(s, sum_ref.shape)
        sq_ref[...] = jnp.broadcast_to(sq, sq_ref.shape)


def _conv_sigmoid_kernel(p_ref, w_ref, b_ref, o_ref, acc_ref):
    """Tiled matmul + bias + Sigmoid (last DiscBlock)."""
    k = pl.program_id(1)

    @pl.when(k == 0)
    def _():
        acc_ref[...] = jnp.zeros_like(acc_ref)

    acc_ref[...] += jnp.dot(p_ref[...], w_ref[...],
                            preferred_element_type=jnp.float32)

    @pl.when(k == pl.num_programs(1) - 1)
    def _():
        z = acc_ref[...] + b_ref[...]
        sig = pl.reciprocal(1.0 + jnp.exp(-z), approx=True)   # EUP exp + EUP rcp
        o_ref[...] = sig.astype(o_ref.dtype)


# ------------------------------- Block wrapper ------------------------------

def disc_block_forward(x_nhwc, w, b, gamma, beta, *, stride, padding,
                       is_last=False, eps=1e-5):
    """One DiscBlock. `x_nhwc` is the (already activated) NHWC input.

    Returns:
      is_last=True : sigmoid(conv + b)                       (NHWC, f32)
      otherwise    : (raw conv output NHWC in bf16, (scale_c, shift_c))
                     The caller applies y*scale+shift then LeakyReLU lazily so
                     XLA fuses it into the next block's im2col (no dedicated
                     elementwise memory pass).
    """
    N, H, W, Cin = x_nhwc.shape
    Cout = w.shape[0]
    KH = KW = 4
    OH = (H + 2 * padding - KH) // stride + 1
    OW = (W + 2 * padding - KW) // stride + 1
    M = N * OH * OW
    K = KH * KW * Cin

    # --- glue: im2col in bf16 (MXU-native) -----------------------------------
    # TODO(synk): stream the 16 taps with strided manual DMAs (pl.ANY input)
    # instead of materializing the 4x-duplicated patch matrix in HBM.
    x = x_nhwc.astype(jnp.bfloat16)
    xp = jnp.pad(x, ((0, 0), (padding, padding), (padding, padding), (0, 0)))
    cols = []
    for kh in range(KH):
        for kw in range(KW):
            cols.append(xp[:, kh:kh + stride * OH:stride,
                           kw:kw + stride * OW:stride, :])
    patches = jnp.concatenate(cols, axis=-1).reshape(M, K)

    # PyTorch weight (Cout,Cin,KH,KW) -> (K,Cout) matching (kh,kw,cin) columns.
    w_mat = jnp.transpose(w, (2, 3, 1, 0)).reshape(K, Cout).astype(jnp.bfloat16)

    # --- tiling ---------------------------------------------------------------
    vmem_limit = _vmem_limit_bytes()
    # >= 2 M tiles whenever possible (v7x: both TensorCores on the parallel
    # axis); small M rounded up to 16 since bf16 vregs pack [16,128].
    TM = 256 if M >= 512 else _round_up(M, 16)
    Mp = _round_up(M, TM)
    Kp = _round_up(K, 128)                 # pad K to 128 only
    Coutp = _round_up(Cout, 128)           # lane-dense output blocks
    TK = _choose_tk(Kp, TM, Coutp, int(vmem_limit) * 3 // 4)
    n_m, n_k = Mp // TM, Kp // TK
    grid = (n_m, n_k)

    patches = jnp.pad(patches, ((0, Mp - M), (0, Kp - K)))
    w_mat = jnp.pad(w_mat, ((0, Kp - K), (0, Coutp - Cout)))

    flops = 2 * Mp * Kp * Coutp
    w_bytes = Kp * Coutp * 2 * (n_m if n_k > 1 else 1)   # weight (re-)fetches

    cparams = pltpu.CompilerParams(
        dimension_semantics=("parallel", "arbitrary"),
        vmem_limit_bytes=int(vmem_limit))
    in_specs = [
        pl.BlockSpec((TM, TK), lambda m, k: (m, k)),
        pl.BlockSpec((TK, Coutp), lambda m, k: (k, 0)),
    ]
    acc_scratch = pltpu.VMEM((TM, Coutp), jnp.float32)

    if is_last:
        bp = jnp.pad(b.astype(jnp.float32), (0, Coutp - Cout)).reshape(1, Coutp)
        out = pl.pallas_call(
            _conv_sigmoid_kernel,
            out_shape=jax.ShapeDtypeStruct((Mp, Coutp), jnp.float32),
            grid=grid,
            in_specs=in_specs + [pl.BlockSpec((1, Coutp), lambda m, k: (0, 0))],
            out_specs=pl.BlockSpec((TM, Coutp), lambda m, k: (m, 0)),
            scratch_shapes=[acc_scratch],
            compiler_params=cparams,
            cost_estimate=pl.CostEstimate(
                flops=flops, transcendentals=2 * Mp * Coutp,
                bytes_accessed=Mp * Kp * 2 + w_bytes + Mp * Coutp * 4),
        )(patches, w_mat, bp)
        return out[:M, :Cout].reshape(N, OH, OW, Cout)

    # Conv bias dropped: per-channel bias is an exact no-op ahead of
    # training-mode BatchNorm (it cancels in y - mean).
    conv_raw, sum8, sq8 = pl.pallas_call(
        _conv_stats_kernel,
        out_shape=(
            jax.ShapeDtypeStruct((Mp, Coutp), jnp.bfloat16),      # bf16 intermediate
            jax.ShapeDtypeStruct((n_m * 8, Coutp), jnp.float32),
            jax.ShapeDtypeStruct((n_m * 8, Coutp), jnp.float32),
        ),
        grid=grid,
        in_specs=in_specs,
        out_specs=(
            pl.BlockSpec((TM, Coutp), lambda m, k: (m, 0)),
            pl.BlockSpec((8, Coutp), lambda m, k: (m, 0)),
            pl.BlockSpec((8, Coutp), lambda m, k: (m, 0)),
        ),
        scratch_shapes=[acc_scratch],
        compiler_params=cparams,
        cost_estimate=pl.CostEstimate(
            flops=flops, transcendentals=0,
            bytes_accessed=(Mp * Kp * 2 + w_bytes + Mp * Coutp * 2
                            + 2 * n_m * 8 * Coutp * 4)),
    )(patches, w_mat)

    # Tiny glue: fold per-tile partial sums into per-channel BN scale/shift.
    total_sum = sum8.reshape(n_m, 8, Coutp)[:, 0, :Cout].sum(axis=0)
    total_sq = sq8.reshape(n_m, 8, Coutp)[:, 0, :Cout].sum(axis=0)
    mean = total_sum / M
    var = jnp.maximum(total_sq / M - mean * mean, 0.0)   # guard cancellation
    inv_std = lax.rsqrt(var + eps)
    scale_c = gamma.astype(jnp.float32) * inv_std
    shift_c = beta.astype(jnp.float32) - mean * scale_c

    raw = conv_raw[:M, :Cout].reshape(N, OH, OW, Cout)
    return raw, (scale_c, shift_c)


def _bn_lrelu(raw_nhwc, scale_c, shift_c):
    """Deferred BatchNorm fold + LeakyReLU(0.2).

    Applied in the wrapper right before the next block's im2col so XLA fuses it
    into patch construction instead of a dedicated memory pass.
    """
    y = raw_nhwc.astype(jnp.float32) * scale_c + shift_c
    return jnp.where(y >= 0.0, y, 0.2 * y).astype(jnp.bfloat16)


# --------------------------- Discriminator wrapper ---------------------------

def discriminator_forward(x_nchw, embed_nchw, params):
    """Full Discriminator forward. x/embed are NCHW (PyTorch layout)."""
    x = jnp.transpose(x_nchw, (0, 2, 3, 1)).astype(jnp.float32)      # NHWC
    e = jnp.transpose(embed_nchw, (0, 2, 3, 1))

    raw1, (s1, t1) = disc_block_forward(x, *params["conv1"], stride=2, padding=1)
    a1 = _bn_lrelu(raw1, s1, t1)
    raw2, (s2, t2) = disc_block_forward(a1, *params["conv2"], stride=2, padding=1)
    a2 = _bn_lrelu(raw2, s2, t2)
    a2 = jnp.concatenate([a2, e.astype(a2.dtype)], axis=-1)   # torch.hstack == channel cat
    raw3, (s3, t3) = disc_block_forward(a2, *params["conv3"], stride=2, padding=1)
    a3 = _bn_lrelu(raw3, s3, t3)
    out4 = disc_block_forward(a3, *params["conv4"], stride=2, padding=1,
                              is_last=True)
    # out4 is NHWC with C=1, so flattening matches PyTorch's NCHW flatten.
    return out4.reshape(out4.shape[0], -1)


# ------------------------------ Pure-JAX reference ---------------------------

def _ref_block(x, w, b, gamma, beta, *, stride, padding, is_last, eps=1e-5):
    y = lax.conv_general_dilated(
        x.astype(jnp.float32), w.astype(jnp.float32),
        window_strides=(stride, stride),
        padding=[(padding, padding), (padding, padding)],
        dimension_numbers=("NCHW", "OIHW", "NCHW"),
    ) + b.reshape(1, -1, 1, 1)
    if is_last:
        return jax.nn.sigmoid(y)
    mean = jnp.mean(y, axis=(0, 2, 3), keepdims=True)
    var = jnp.mean(jnp.square(y - mean), axis=(0, 2, 3), keepdims=True)
    y = (y - mean) * lax.rsqrt(var + eps)
    y = y * gamma.reshape(1, -1, 1, 1) + beta.reshape(1, -1, 1, 1)
    return jnp.where(y >= 0, y, 0.2 * y)


def _ref_discriminator(x, embed, params):
    o1 = _ref_block(x, *params["conv1"], stride=2, padding=1, is_last=False)
    o2 = _ref_block(o1, *params["conv2"], stride=2, padding=1, is_last=False)
    o2 = jnp.concatenate([o2, embed.astype(jnp.float32)], axis=1)
    o3 = _ref_block(o2, *params["conv3"], stride=2, padding=1, is_last=False)
    o4 = _ref_block(o3, *params["conv4"], stride=2, padding=1, is_last=True)
    return o4.reshape(o4.shape[0], -1)


# ------------------------------------ Main -----------------------------------

def _init_block(key, in_c, out_c):
    k1, k2 = jax.random.split(key)
    fan_in = in_c * 16
    bound = 1.0 / (fan_in ** 0.5)
    w = jax.random.uniform(k1, (out_c, in_c, 4, 4), minval=-bound, maxval=bound,
                           dtype=jnp.float32)
    b = jax.random.uniform(k2, (out_c,), minval=-bound, maxval=bound,
                           dtype=jnp.float32)
    gamma = jnp.ones((out_c,), jnp.float32)   # BatchNorm2d default affine init
    beta = jnp.zeros((out_c,), jnp.float32)
    return (w, b, gamma, beta)


if __name__ == "__main__":
    key = jax.random.PRNGKey(0)
    kx, ke, k1, k2, k3, k4 = jax.random.split(key, 6)

    # Small shapes consistent with the module: channels fixed by Discriminator,
    # spatial 32 so every conv has a valid output. embed joins conv2's output
    # (channels 304 - 256 = 48, spatial H/4).
    N, H, W = 2, 32, 32
    x = jax.random.normal(kx, (N, 3, H, W), dtype=jnp.float32)
    embed = jax.random.normal(ke, (N, 48, H // 4, W // 4), dtype=jnp.float32)

    params = {
        "conv1": _init_block(k1, 3, 128),
        "conv2": _init_block(k2, 128, 256),
        "conv3": _init_block(k3, 304, 512),
        "conv4": _init_block(k4, 512, 1),
    }

    # Sanity-check the first block (conv + deferred BN/LReLU) vs the reference.
    x_nhwc = jnp.transpose(x, (0, 2, 3, 1))
    raw1, (s1, t1) = disc_block_forward(x_nhwc, *params["conv1"],
                                        stride=2, padding=1)
    out1 = jax.block_until_ready(_bn_lrelu(raw1, s1, t1))
    ref1 = jnp.transpose(_ref_block(x, *params["conv1"], stride=2, padding=1,
                                    is_last=False), (0, 2, 3, 1))
    assert out1.shape == (N, H // 2, W // 2, 128)
    assert jnp.allclose(out1.astype(jnp.float32), ref1, atol=5e-2, rtol=5e-2), (
        float(jnp.max(jnp.abs(out1.astype(jnp.float32) - ref1))))

    # Full discriminator.
    disc = jax.jit(discriminator_forward)
    out = disc(x, embed, params)
    out = jax.block_until_ready(out)

    ref = _ref_discriminator(x, embed, params)
    assert out.shape == ref.shape == (N, (H // 16) * (W // 16))
    # bf16 MXU operands + bf16 intermediates => relaxed tolerance vs f32 ref.
    assert jnp.allclose(out.astype(jnp.float32), ref, atol=4e-2, rtol=4e-2), (
        float(jnp.max(jnp.abs(out.astype(jnp.float32) - ref))))

    print("KERNEL_OK")
</pallas_src>

<mosaic_0001>
module attributes {stable_mosaic.version = 11 : i64} {
  func.func @_conv_stats_kernel(%arg0: i32, %arg1: i32, %arg2: memref<256x128xbf16, #tpu.memory_space<vmem>>, %arg3: memref<128x128xbf16, #tpu.memory_space<vmem>>, %arg4: memref<256x128xbf16, #tpu.memory_space<vmem>>, %arg5: memref<8x128xf32, #tpu.memory_space<vmem>>, %arg6: memref<8x128xf32, #tpu.memory_space<vmem>>, %arg7: memref<256x128xf32, #tpu.memory_space<vmem>>) attributes {dimension_semantics = [#tpu.dimension_semantics<parallel>, #tpu.dimension_semantics<arbitrary>], iteration_bounds = array<i64: 2, 1>, scalar_prefetch = 0 : i64, scratch_operands = 1 : i64, tpu.core_type = #tpu.core_type<tc>, window_params = [{transform_indices = @transform_0, window_bounds = array<i64: 256, 128>}, {transform_indices = @transform_1, window_bounds = array<i64: 128, 128>}, {transform_indices = @transform_2, window_bounds = array<i64: 256, 128>}, {transform_indices = @transform_3, window_bounds = array<i64: 8, 128>}, {transform_indices = @transform_4, window_bounds = array<i64: 8, 128>}]} {
    %c0_i32 = arith.constant 0 : i32
    %0 = arith.cmpi eq, %arg1, %c0_i32 : i32
    %1 = arith.extui %0 : i1 to i32
    %c0_i32_0 = arith.constant 0 : i32
    %2 = arith.cmpi ne, %1, %c0_i32_0 : i32
    scf.if %2 {
      %cst_10 = arith.constant 0.000000e+00 : f32
      %12 = vector.broadcast %cst_10 : f32 to vector<256x128xf32>
      %c0_11 = arith.constant 0 : index
      %c0_12 = arith.constant 0 : index
      %13 = vector.load %arg7[%c0_11, %c0_12] : memref<256x128xf32, #tpu.memory_space<vmem>>, vector<256x128xf32>
      tpu.vector_store %arg7[%c0_11, %c0_12], %12 {strides = array<i32>} : memref<256x128xf32, #tpu.memory_space<vmem>>, vector<256x128xf32>,
    } else {
    }
    %c0 = arith.constant 0 : index
    %c0_1 = arith.constant 0 : index
    %3 = vector.load %arg7[%c0, %c0_1] : memref<256x128xf32, #tpu.memory_space<vmem>>, vector<256x128xf32>
    %c0_2 = arith.constant 0 : index
    %c0_3 = arith.constant 0 : index
    %4 = vector.load %arg2[%c0_2, %c0_3] : memref<256x128xbf16, #tpu.memory_space<vmem>>, vector<256x128xbf16>
    %c0_4 = arith.constant 0 : index
    %c0_5 = arith.constant 0 : index
    %5 = vector.load %arg3[%c0_4, %c0_5] : memref<128x128xbf16, #tpu.memory_space<vmem>>, vector<128x128xbf16>
    %cst = arith.constant dense<0.000000e+00> : vector<256x128xf32>
    %6 = tpu.matmul %4, %5, %cst {dimension_numbers = #tpu.dot_dimension_numbers<[1], [0], [0], [1], [0, 0, 1, 1], [], []>} : vector<256x128xbf16>, vector<128x128xbf16>, vector<256x128xf32> -> vector<256x128xf32>
    %7 = arith.addf %3, %6 : vector<256x128xf32>
    %c0_6 = arith.constant 0 : index
    %c0_7 = arith.constant 0 : index
    %8 = vector.load %arg7[%c0_6, %c0_7] : memref<256x128xf32, #tpu.memory_space<vmem>>, vector<256x128xf32>
    tpu.vector_store %arg7[%c0_6, %c0_7], %7 {strides = array<i32>} : memref<256x128xf32, #tpu.memory_space<vmem>>, vector<256x128xf32>,
    %c0_i32_8 = arith.constant 0 : i32
    %9 = arith.cmpi eq, %arg1, %c0_i32_8 : i32
    %10 = arith.extui %9 : i1 to i32
    %c0_i32_9 = arith.constant 0 : i32
    %11 = arith.cmpi ne, %10, %c0_i32_9 : i32
    scf.if %11 {
      %c0_10 = arith.constant 0 : index
      %c0_11 = arith.constant 0 : index
      %12 = vector.load %arg7[%c0_10, %c0_11] : memref<256x128xf32, #tpu.memory_space<vmem>>, vector<256x128xf32>
      %13 = arith.truncf %12 : vector<256x128xf32> to vector<256x128xbf16>
      %c0_12 = arith.constant 0 : index
      %c0_13 = arith.constant 0 : index
      %14 = vector.load %arg4[%c0_12, %c0_13] : memref<256x128xbf16, #tpu.memory_space<vmem>>, vector<256x128xbf16>
      tpu.vector_store %arg4[%c0_12, %c0_13], %13 {strides = array<i32>} : memref<256x128xbf16, #tpu.memory_space<vmem>>, vector<256x128xbf16>,
      %cst_14 = arith.constant dense<0.000000e+00> : vector<128xf32>
      %15 = vector.multi_reduction <add>, %12, %cst_14 [0] : vector<256x128xf32> to vector<128xf32>
      %16 = vector.shape_cast %15 : vector<128xf32> to vector<1x128xf32>
      %17 = arith.mulf %12, %12 : vector<256x128xf32>
      %cst_15 = arith.constant dense<0.000000e+00> : vector<128xf32>
      %18 = vector.multi_reduction <add>, %17, %cst_15 [0] : vector<256x128xf32> to vector<128xf32>
      %19 = vector.shape_cast %18 : vector<128xf32> to vector<1x128xf32>
      %20 = vector.shape_cast %16 : vector<1x128xf32> to vector<1x128xf32>
      %21 = vector.broadcast %20 : vector<1x128xf32> to vector<8x128xf32>
      %c0_16 = arith.constant 0 : index
      %c0_17 = arith.constant 0 : index
      %22 = vector.load %arg5[%c0_16, %c0_17] : memref<8x128xf32, #tpu.memory_space<vmem>>, vector<8x128xf32>
      tpu.vector_store %arg5[%c0_16, %c0_17], %21 {strides = array<i32>} : memref<8x128xf32, #tpu.memory_space<vmem>>, vector<8x128xf32>,
      %23 = vector.shape_cast %19 : vector<1x128xf32> to vector<1x128xf32>
      %24 = vector.broadcast %23 : vector<1x128xf32> to vector<8x128xf32>
      %c0_18 = arith.constant 0 : index
      %c0_19 = arith.constant 0 : index
      %25 = vector.load %arg6[%c0_18, %c0_19] : memref<8x128xf32, #tpu.memory_space<vmem>>, vector<8x128xf32>
      tpu.vector_store %arg6[%c0_18, %c0_19], %24 {strides = array<i32>} : memref<8x128xf32, #tpu.memory_space<vmem>>, vector<8x128xf32>,
    } else {
    }
    return
  }
  func.func @transform_0(%arg0: i32, %arg1: i32) -> (i32, i32) {
    %c0_i32 = arith.constant 0 : i32
    return %arg0, %arg1 : i32, i32
  }
  func.func @transform_1(%arg0: i32, %arg1: i32) -> (i32, i32) {
    %c0_i32 = arith.constant 0 : i32
    %c0_i32_0 = arith.constant 0 : i32
    return %arg1, %c0_i32 : i32, i32
  }
  func.func @transform_2(%arg0: i32, %arg1: i32) -> (i32, i32) {
    %c0_i32 = arith.constant 0 : i32
    %c0_i32_0 = arith.constant 0 : i32
    return %arg0, %c0_i32 : i32, i32
  }
  func.func @transform_3(%arg0: i32, %arg1: i32) -> (i32, i32) {
    %c0_i32 = arith.constant 0 : i32
    %c0_i32_0 = arith.constant 0 : i32
    return %arg0, %c0_i32 : i32, i32
  }
  func.func @transform_4(%arg0: i32, %arg1: i32) -> (i32, i32) {
    %c0_i32 = arith.constant 0 : i32
    %c0_i32_0 = arith.constant 0 : i32
    return %arg0, %c0_i32 : i32, i32
  }
}

</mosaic_0001>

<bundles_post_ra>
// kernel: tpu_custom_call.1
= control target key start
LH: loop header
LB: loop body
LE: loop exit
PB: predicated region body
PF: predicated region fallthrough
CT: control target
= control target key end

     0   :  { %s2296_s0 = inlined_call_operand.hbm [shape: bf16[512,128], index: 0, kind: input, shape index: {}]   ;;  %s2297_s1 = inlined_call_operand.hbm [shape: bf16[128,128], index: 1, kind: input, shape index: {}]   ;;  %s2298_s2 = inlined_call_operand.hbm [shape: bf16[512,128], index: 2, kind: output, shape index: {0}]   ;;  %s2299_s3 = inlined_call_operand.hbm [shape: f32[16,128], index: 3, kind: output, shape index: {1}]   ;;  %s2300_s4 = inlined_call_operand.hbm [shape: f32[16,128], index: 4, kind: output, shape index: {2}]  }
   0x1   :  { %2305 = sst [smem:[#allocation16_spill]] %s2297_s1 }
   0x2   :  { %10 = vsyncpa [#allocation4], 0 }
   0x3   :  { %12 = vsyncpa [#allocation4 + $0x1], 0 }
   0x4   :  { %13 = vsyncpa [#allocation7], 0 }
   0x5   :  { %14 = vsyncpa [#allocation5], 0 }
   0x6   :  { %16 = vsyncpa [#allocation5 + $0x1], 0 }
   0x7   :  { %17 = vsyncpa [#allocation10], 0 }
   0x8   :  { %19 = vsyncpa [#allocation10 + $0x1], 0  ;;  %s1907_s15 = smov 0   ;;  %s1909_s16 = smov 0  }
   0x9   :  { %s1911_s17 = smov 0   ;;  %s1913_s18 = smov 0  }
   0xa   :  { %s1915_s19 = smov 0   ;;  %s1917_s20 = smov 0  }
   0xb LB: > { %s1938_s21 = sadd.s32 4294967295, %s1871_s20   ;;  %s2301_s22 = sadd.s32 4294967294, %s1871_s20   ;;  %s1871_s20 = sphi %s1917_s20, %s25_s20   ;;  %s1867_s19 = sphi %s1915_s19, %s2326_s19   ;;  %s1863_s18 = sphi %s1913_s18, %s2325_s18   ;;  %s1859_s17 = sphi %s1911_s17, %s2324_s17   ;;  %s1855_s16 = sphi %s1909_s16, %s2323_s16   ;;  %s1851_s15 = sphi %s1907_s15, %s2322_s15  }
   0xc   : > { %p59_p0 = scmp.ne.s32.totalorder %s1855_s16, %s1851_s15  ;;  %p2304_p1 = scmp.eq.s32.totalorder %s1938_s21, 0 }
   0xd   : > { %p115_p3 = scmp.eq.s32.totalorder %s2301_s22, 1  ;;  %p1272_p5 = scmp.ge.s32.totalorder %s1871_s20, 1 }
   0xe   : > { %p1949_p4 = por %p2304_p1, %p59_p0  ;;  %p174_p7 = scmp.lt.s32.totalorder %s1871_s20, 3 }
   0xf   : > { %p1954_p6 = por %p115_p3, %p59_p0  ;;  %s1873_s26 = smov [#allocation6]  }
  0x10   : > { %p1959_p8 = pnand %p1272_p5, %p174_p7  ;;  %s189_s27 = sshll.u32 %s1873_s26, 4  ;;  %s190_s27 = int_to_ptr.vmem [resolvable:$true] %s189_s27 }
  0x11   : > { %s2307_s24 = scalar_select %p1954_p6, 1, 0 }
  0x12   : > { %p1578_p9 = pneg %p1959_p8  ;;  %s37_s29 = sadd.s32 1, %s1867_s19 }
  0x13   : > { %s1688_s30 = scalar_lea.vmem %s190_s27, 1024  ;;  %p1696_p5 = scmp.lt.s32.totalorder %s190_s27, %s190_s27 }
  0x14   : > { %p1968_p11 = pnand %p1578_p9, %p2304_p1  ;;  %p1689_p13 = scmp.ne.s32.totalorder %s190_s27, %s1688_s30 }
  0x15   : > { %p1697_p7 = scmp.lt.s32.totalorder %s1688_s30, %s1688_s30 }
  0x16   : > { %p1679_p12 = pneg %p1968_p11 }
  0x17   : > { %p1698_p2 = por %p1697_p7, %p1696_p5 }
  0x18   : > { %p1691_p0 = pnand %p1689_p13, %p1679_p12 }
  0x1a   : > { %p1692_p3 = pneg %p1691_p0 }
  0x1c   : > { %p1699_p6 = pnand %p1698_p2, %p1692_p3 }
  0x1e   : > { %1702 = shalt.err (!%p1699_p6)
}
  0x1f   : > { %s2302_s5 = smov 64   ;;  %s2303_s6 = smov 4  }
  0x20   : > { %s2310_s1 = sld [smem:[#allocation16_spill]]  ;;  %p39_p2 = scmp.ge.s32.totalorder %s37_s29, 2 }
  0x21   : > { %s46_s9 = sadd.s32 1, %s1859_s17  ;;  %p53_p6 = scmp.ne.s32.totalorder %s1859_s17, %s1855_s16 }
  0x22   : > { %p54_p9 = scmp.eq.s32.totalorder %s1871_s20, 0  ;;  %s2328_s29 = smov (%p39_p2, %s37_s29), 0 }
  0x23   : > { %p2312_p13 = scmp.eq.s32.totalorder %s1938_s21, 1  ;;  %s41_s12 = ssub.s32 %s1867_s19, %s2328_s29 }
  0x24   : > { %p1989_p12 = por %p54_p9, %p53_p6  ;;  %p1597_p3 = scmp.lt.s32.totalorder %s1871_s20, 2 }
  0x25   : > { %p1995_p0 = por %p2312_p13, %p53_p6  ;;  %s203_s13 = sand.u32 1, %s1859_s17  }
  0x26   : > { %1581 = dma.hbm_to_vmem [thread:$0]  (!%p1968_p11), %s2310_s1, 1024, %s190_s27, [#allocation7], %s2302_s5, %s2302_s5, %s2303_s6  }
  0x27   : > { %p44_p11 = scmp.eq.s32.totalorder %s41_s12, 0  ;;  %s1275_s14 = sshll.u32 %s203_s13, 7 }
  0x28   : > { %s1349_s27 = sshll.u32 %s1867_s19, 11  ;;  %s207_s8 = scalar_lea.vmem [#allocation3], %s1275_s14 }
  0x29   : > { %s2004_s26 = scalar_select %p44_p11, %s1859_s17, %s46_s9  }
  0x2a   : > { %s214_s7 = scalar_lea.hbm %s2296_s0, %s1349_s27  ;;  %s215_s22 = sshll.u32 %s207_s8, 4  ;;  %s216_s22 = int_to_ptr.vmem [resolvable:$true] %s215_s22 }
  0x2b   : > { %p2012_p5 = pnand %p1597_p3, %p1989_p12  ;;  %s204_s6 = scalar_lea.sflag [#allocation4], %s203_s13 }
  0x2c   : > { %s1716_s12 = scalar_lea.vmem %s216_s22, 2048  ;;  %s1876_s9 = smov [#allocation3]  }
  0x2d   : > { %p1705_p7 = pneg %p2012_p5  ;;  %p1717_p2 = scmp.ne.s32.totalorder %s216_s22, %s1716_s12 }
  0x2e   : > { %s1721_s1 = sshll.u32 %s1876_s9, 4  ;;  %s1722_s1 = int_to_ptr.vmem [resolvable:$false] %s1721_s1 }
  0x2f   : > { %p1719_p6 = pnand %p1717_p2, %p1705_p7  ;;  %s1723_s27 = scalar_lea.vmem %s1722_s1, 4096 }
  0x30   : > { %p1724_p13 = scmp.lt.s32.totalorder %s216_s22, %s1722_s1  ;;  %p1725_p11 = scmp.lt.s32.totalorder %s1723_s27, %s1716_s12 }
  0x31   : > { %p1720_p9 = pneg %p1719_p6 }
  0x32   : > { %p1726_p10 = por %p1725_p11, %p1724_p13 }
  0x34   : > { %p1727_p1 = pnand %p1726_p10, %p1720_p9 }
  0x36   : > { %1730 = shalt.err (!%p1727_p1)
}
  0x37   : > { %s2315_s10 = smov 4   ;;  %s2316_s14 = smov 64  }
  0x38   : > { %1585 = dma.hbm_to_vmem [thread:$0]  (!%p2012_p5), %s214_s7, 2048, %s216_s22, %s204_s6, %s2316_s14, %s2316_s14, %s2315_s10  }
  0x39   : > { %227 = sbr.rel (%p1959_p8) target bundleno = 416 (0x1a0), region = 28  ;;  %s2026_s13 = sand.u32 (!%p1959_p8), 1, %s1855_s16  }
  0x3a   : > { %s1279_s1 = sshll.u32 (!%p1959_p8), %s2026_s13, 7  ;;  %s230_s28 = scalar_lea.sflag (!%p1959_p8), [#allocation4], %s2026_s13 }
  0x3b   : > { %s2032_s30 = scalar_lea.vmem (!%p1959_p8), [#allocation3], %s1279_s1 }
  0x3e   : > { %1834 = dma.done.wait (%p1949_p4), %s230_s28, 2048  }
  0x3f   : > { %1836 = vsyncadd (%p1949_p4), %s230_s28, 4294965248  ;;  %p2317_p1 = scmp.eq.s32.totalorder %s1938_s21, 0 }
  0x41   : > { %1838 = dma.done.wait (%p2317_p1), [#allocation7], 1024   ;;  %p2318_p8 = pmov %p2317_p1 }
  0x42   : > { %v1653_v0 = vld [vmem:[#allocation6 + $0x38] sm:$0xff]   ;;  %v1654_v1 = vld [vmem:[#allocation6 + $0x30] sm:$0xff]   ;;  %v1655_v2 = vld [vmem:[#allocation6 + $0x28] sm:$0xff]   ;;  %s2070_s22 = scalar_lea.vmem [#allocation8], %s1279_s1  ;;  %s1382_s23 = sshll.u32 %s1863_s18, 11 }
  0x43   : > { %1840 = vsyncadd (%p2318_p8), [#allocation7], 4294966272  ;;  %1502 = vmatprep.subr.bf16.mxu0 %v1653_v0  ;;  %1550 = vmatprep.subr.bf16.mxu1 %v1653_v0  ;;  %v1656_v3 = vld [vmem:[#allocation6 + $0x20] sm:$0xff]   ;;  %v1657_v5 = vld [vmem:[#allocation6 + $0x18] sm:$0xff]   ;;  %s1088_s25 = sshll.u32 %s2070_s22, 4  ;;  %s2126_s7 = scalar_lea.hbm %s2298_s2, %s1382_s23  ;;  %s2128_s25 = int_to_ptr.vmem [resolvable:$true] %s1088_s25 }
  0x44   : > { %1503 = vmatpush3.bf16.msra.mxu0 %v1653_v0  ;;  %1558 = vmatpush3.bf16.msra.mxu1 %v1653_v0  ;;  %v1661_v4 = vld [vmem:[%s2032_s30] sm:$0xff]   ;;  %v1658_v6 = vld [vmem:[#allocation6 + $0x10] sm:$0xff]   ;;  %v1659_v8 = vld [vmem:[#allocation6 + $0x8] sm:$0xff]   ;;  %s1065_s8 = scalar_lea.sflag [#allocation5], %s2026_s13  ;;  %s1731_s12 = scalar_lea.vmem %s2128_s25, 2048 }
  0x45   : > { %1504 = vmatprep.subr.bf16.mxu0 %v1654_v1  ;;  %1551 = vmatprep.subr.bf16.mxu1 %v1654_v1  ;;  %v1669_v7 = vld [vmem:[%s2032_s30 + $0x40] sm:$0xff]   ;;  %v1662_v10 = vld [vmem:[%s2032_s30 + $0x8] sm:$0xff]   ;;  %v1663_v12 = vld [vmem:[%s2032_s30 + $0x10] sm:$0xff]   ;;  %p1732_p4 = scmp.ne.s32.totalorder %s2128_s25, %s1731_s12  ;;  %s1877_s9 = smov [#allocation8]  }
  0x46   : > { %1518 = vmatprep.mubr.bf16.mxu0 %v1661_v4  ;;  %1534 = vmatprep.mubr.bf16.mxu1 %v1669_v7  ;;  %v1660_v9 = vld [vmem:[#allocation6] sm:$0xff]   ;;  %v1670_v11 = vld [vmem:[%s2032_s30 + $0x48] sm:$0xff]   ;;  %v1671_v13 = vld [vmem:[%s2032_s30 + $0x50] sm:$0xff]   ;;  %s1735_s27 = sshll.u32 %s1877_s9, 4  ;;  %s1736_s27 = int_to_ptr.vmem [resolvable:$false] %s1735_s27 }
  0x47   : > { %v1664_v14 = vld [vmem:[%s2032_s30 + $0x18] sm:$0xff]   ;;  %v1665_v16 = vld [vmem:[%s2032_s30 + $0x20] sm:$0xff]   ;;  %v1666_v18 = vld [vmem:[%s2032_s30 + $0x28] sm:$0xff]   ;;  %p1733_p10 = pnand %p1732_p4, %p1995_p0  ;;  %s1737_s10 = scalar_lea.vmem %s1736_s27, 4096 }
  0x48   : > { %1505 = vmatpush3.bf16.msra.mxu0 %v1654_v1  ;;  %1559 = vmatpush3.bf16.msra.mxu1 %v1654_v1  ;;  %v1672_v15 = vld [vmem:[%s2032_s30 + $0x58] sm:$0xff]   ;;  %v1673_v17 = vld [vmem:[%s2032_s30 + $0x60] sm:$0xff]   ;;  %v1674_v19 = vld [vmem:[%s2032_s30 + $0x68] sm:$0xff]   ;;  %p1738_p3 = scmp.lt.s32.totalorder %s2128_s25, %s1736_s27  ;;  %p1739_p5 = scmp.lt.s32.totalorder %s1737_s10, %s1731_s12 }
  0x49   : > { %1506 = vmatprep.subr.bf16.mxu0 %v1655_v2  ;;  %1552 = vmatprep.subr.bf16.mxu1 %v1655_v2  ;;  %v1667_v20 = vld [vmem:[%s2032_s30 + $0x30] sm:$0xff]   ;;  %v1668_v22 = vld [vmem:[%s2032_s30 + $0x38] sm:$0xff]   ;;  %p1734_p12 = pneg %p1733_p10 }
  0x4a   : > { %v1675_v21 = vld [vmem:[%s2032_s30 + $0x70] sm:$0xff]   ;;  %v1676_v23 = vld [vmem:[%s2032_s30 + $0x78] sm:$0xff]   ;;  %p1740_p7 = por %p1739_p5, %p1738_p3 }
  0x4c   : > { %1507 = vmatpush3.bf16.msra.mxu0 %v1655_v2  ;;  %1560 = vmatpush3.bf16.msra.mxu1 %v1655_v2  ;;  %p1741_p2 = pnand %p1740_p7, %p1734_p12 }
  0x4d   : > { %1508 = vmatprep.subr.bf16.mxu0 %v1656_v3  ;;  %1553 = vmatprep.subr.bf16.mxu1 %v1656_v3 }
  0x50   : > { %1509 = vmatpush3.bf16.msra.mxu0 %v1656_v3  ;;  %1561 = vmatpush3.bf16.msra.mxu1 %v1656_v3 }
  0x51   : > { %1510 = vmatprep.subr.bf16.mxu0 %v1657_v5  ;;  %1554 = vmatprep.subr.bf16.mxu1 %v1657_v5 }
  0x54   : > { %1511 = vmatpush3.bf16.msra.mxu0 %v1657_v5  ;;  %1562 = vmatpush3.bf16.msra.mxu1 %v1657_v5 }
  0x55   : > { %1512 = vmatprep.subr.bf16.mxu0 %v1658_v6  ;;  %1555 = vmatprep.subr.bf16.mxu1 %v1658_v6 }
  0x58   : > { %1513 = vmatpush3.bf16.msra.mxu0 %v1658_v6  ;;  %1563 = vmatpush3.bf16.msra.mxu1 %v1658_v6 }
  0x59   : > { %1514 = vmatprep.subr.bf16.mxu0 %v1659_v8  ;;  %1556 = vmatprep.subr.bf16.mxu1 %v1659_v8 }
  0x5c   : > { %1515 = vmatpush3.bf16.msra.mxu0 %v1659_v8  ;;  %1564 = vmatpush3.bf16.msra.mxu1 %v1659_v8 }
  0x5d   : > { %1516 = vmatprep.subr.bf16.mxu0 %v1660_v9  ;;  %1557 = vmatprep.subr.bf16.mxu1 %v1660_v9 }
  0x60   : > { %1517 = vmatpush3.bf16.msra.mxu0 %v1660_v9  ;;  %1565 = vmatpush3.bf16.msra.mxu1 %v1660_v9 }
  0x63   : > { %1519 = vmatmul.mubr.bf16.vlgmr.msra.gmra.mxu0 %v1662_v10  ;;  %1535 = vmatmul.mubr.bf16.vlgmr.msra.gmra.mxu1 %v1670_v11 }
  0x64   : > { %1522 = vmatprep.mubr.bf16.mxu0 %v1663_v12  ;;  %1538 = vmatprep.mubr.bf16.mxu1 %v1671_v13 }
  0x6b   : > { %1523 = vmatmul.mubr.bf16.gmra.mxu0 %v1664_v14  ;;  %1539 = vmatmul.mubr.bf16.gmra.mxu1 %v1672_v15 }
  0x6c   : > { %1526 = vmatprep.mubr.bf16.mxu0 %v1665_v16  ;;  %1542 = vmatprep.mubr.bf16.mxu1 %v1673_v17 }
  0x73   : > { %1527 = vmatmul.mubr.bf16.gmra.mxu0 %v1666_v18  ;;  %1543 = vmatmul.mubr.bf16.gmra.mxu1 %v1674_v19 }
  0x74   : > { %1530 = vmatprep.mubr.bf16.mxu0 %v1667_v20  ;;  %1546 = vmatprep.mubr.bf16.mxu1 %v1675_v21 }
  0x7b   : > { %1531 = vmatmul.mubr.bf16.gmra.mxu0 %v1668_v22  ;;  %1547 = vmatmul.mubr.bf16.gmra.mxu1 %v1676_v23 }
 0x123   : > { %v1520_v24 = vpop.f32.mrf.mxu0  ;;  %v2058_v25 = vpop.f32.mrf.mxu1 }
 0x124   : > { %v995_v41 = vmul.f32 %v1520_v24, %v1520_v24 }
 0x125   : > { %v570_v26 = vpop.f32.mrf.mxu0  ;;  %v2060_v27 = vpop.f32.mrf.mxu1 }
 0x126   : > { %v993_v32 = vmul.f32 %v570_v26, %v570_v26 }
 0x127   : > { %v1521_v28 = vpop.f32.mrf.mxu0  ;;  %v2062_v29 = vpop.f32.mrf.mxu1 }
 0x128   : > { %v1391_v30 = vpack.c.bf16 %v1521_v28, %v1520_v24  ;;  %v1431_v31 = vpack.c.bf16 %v2062_v29, %v2058_v25  ;;  %v996_v46 = vmul.f32 %v1521_v28, %v1521_v28 }
 0x129   : > { %v573_v33 = vpop.f32.mrf.mxu0  ;;  %v2066_v34 = vpop.f32.mrf.mxu1 }
 0x12a   : > { %1463 = vst [vmem:[%s2070_s22 + $0x8] sm:$0xff] %v1391_v30   ;;  %v1386_v35 = vpack.c.bf16 %v573_v33, %v570_v26  ;;  %v956_v36 = vadd.f32 %v573_v33, %v570_v26  ;;  %v994_v37 = vmul.f32 %v573_v33, %v573_v33  ;;  %1471 = vst [vmem:[%s2070_s22 + $0x48] sm:$0xff] %v1431_v31  }
 0x12b   : > { %v1426_v38 = vpack.c.bf16 %v2066_v34, %v2060_v27  ;;  %v1524_v39 = vpop.f32.mrf.mxu0  ;;  %v2076_v40 = vpop.f32.mrf.mxu1 }
 0x12c   : > { %1387 = vst [vmem:[%s2070_s22] sm:$0xff] %v1386_v35   ;;  %v957_v42 = vadd.f32 %v1520_v24, %v956_v36  ;;  %v1025_v43 = vadd.f32 %v994_v37, %v993_v32  ;;  %v999_v1 = vmul.f32 %v1524_v39, %v1524_v39 }
 0x12d   : > { %1470 = vst [vmem:[%s2070_s22 + $0x40] sm:$0xff] %v1426_v38   ;;  %v586_v44 = vpop.f32.mrf.mxu0  ;;  %v2080_v45 = vpop.f32.mrf.mxu1 }
 0x12e   : > { %v1026_v47 = vadd.f32 %v1025_v43, %v995_v41  ;;  %v958_v48 = vadd.f32 %v1521_v28, %v957_v42  ;;  %v997_v52 = vmul.f32 %v586_v44, %v586_v44 }
 0x12f   : > { %v1525_v49 = vpop.f32.mrf.mxu0  ;;  %v2082_v50 = vpop.f32.mrf.mxu1 }
 0x130   : > { %v959_v51 = vadd.f32 %v958_v48, %v586_v44  ;;  %v1027_v53 = vadd.f32 %v1026_v47, %v996_v46  ;;  %v1401_v54 = vpack.c.bf16 %v1525_v49, %v1524_v39  ;;  %v1441_v56 = vpack.c.bf16 %v2082_v50, %v2076_v40 }
 0x131   : > { %v589_v55 = vpop.f32.mrf.mxu0  ;;  %v2086_v57 = vpop.f32.mrf.mxu1  ;;  %v1000_v6 = vmul.f32 %v1525_v49, %v1525_v49 }
 0x132   : > { %v1028_v58 = vadd.f32 %v1027_v53, %v997_v52  ;;  %1465 = vst [vmem:[%s2070_s22 + $0x18] sm:$0xff] %v1401_v54   ;;  %v1396_v59 = vpack.c.bf16 %v589_v55, %v586_v44  ;;  %v960_v60 = vadd.f32 %v959_v51, %v589_v55  ;;  %v998_v61 = vmul.f32 %v589_v55, %v589_v55 }
 0x133   : > { %v1528_v62 = vpop.f32.mrf.mxu0  ;;  %1473 = vst [vmem:[%s2070_s22 + $0x58] sm:$0xff] %v1441_v56   ;;  %v1436_v63 = vpack.c.bf16 %v2086_v57, %v2080_v45  ;;  %v2092_v0 = vpop.f32.mrf.mxu1 }
 0x134   : > { %1464 = vst [vmem:[%s2070_s22 + $0x10] sm:$0xff] %v1396_v59   ;;  %v961_v2 = vadd.f32 %v1524_v39, %v960_v60  ;;  %v1029_v3 = vadd.f32 %v1028_v58, %v998_v61  ;;  %v1003_v26 = vmul.f32 %v1528_v62, %v1528_v62 }
 0x135   : > { %v602_v4 = vpop.f32.mrf.mxu0  ;;  %1472 = vst [vmem:[%s2070_s22 + $0x50] sm:$0xff] %v1436_v63   ;;  %v2096_v5 = vpop.f32.mrf.mxu1 }
 0x136   : > { %v1030_v7 = vadd.f32 %v1029_v3, %v999_v1  ;;  %v962_v8 = vadd.f32 %v1525_v49, %v961_v2  ;;  %v1001_v12 = vmul.f32 %v602_v4, %v602_v4 }
 0x137   : > { %v1529_v9 = vpop.f32.mrf.mxu0  ;;  %v2098_v10 = vpop.f32.mrf.mxu1 }
 0x138   : > { %v963_v11 = vadd.f32 %v962_v8, %v602_v4  ;;  %v1031_v13 = vadd.f32 %v1030_v7, %v1000_v6  ;;  %v1411_v14 = vpack.c.bf16 %v1529_v9, %v1528_v62  ;;  %v1451_v16 = vpack.c.bf16 %v2098_v10, %v2092_v0 }
 0x139   : > { %v605_v15 = vpop.f32.mrf.mxu0  ;;  %v2102_v17 = vpop.f32.mrf.mxu1  ;;  %v1004_v33 = vmul.f32 %v1529_v9, %v1529_v9 }
 0x13a   : > { %v1032_v18 = vadd.f32 %v1031_v13, %v1001_v12  ;;  %1467 = vst [vmem:[%s2070_s22 + $0x28] sm:$0xff] %v1411_v14   ;;  %v1406_v19 = vpack.c.bf16 %v605_v15, %v602_v4  ;;  %v964_v20 = vadd.f32 %v963_v11, %v605_v15  ;;  %v1002_v21 = vmul.f32 %v605_v15, %v605_v15 }
 0x13b   : > { %v1532_v22 = vpop.f32.mrf.mxu0  ;;  %1475 = vst [vmem:[%s2070_s22 + $0x68] sm:$0xff] %v1451_v16   ;;  %v1446_v23 = vpack.c.bf16 %v2102_v17, %v2096_v5  ;;  %v2108_v24 = vpop.f32.mrf.mxu1 }
 0x13c   : > { %1466 = vst [vmem:[%s2070_s22 + $0x20] sm:$0xff] %v1406_v19   ;;  %v965_v28 = vadd.f32 %v1528_v62, %v964_v20  ;;  %v1033_v30 = vadd.f32 %v1032_v18, %v1002_v21  ;;  %v1007_v54 = vmul.f32 %v1532_v22, %v1532_v22 }
 0x13d   : > { %v618_v31 = vpop.f32.mrf.mxu0  ;;  %1474 = vst [vmem:[%s2070_s22 + $0x60] sm:$0xff] %v1446_v23   ;;  %v2112_v32 = vpop.f32.mrf.mxu1 }
 0x13e   : > { %v1034_v35 = vadd.f32 %v1033_v30, %v1003_v26  ;;  %v966_v36 = vadd.f32 %v1529_v9, %v965_v28  ;;  %v1005_v41 = vmul.f32 %v618_v31, %v618_v31 }
 0x13f   : > { %v1533_v37 = vpop.f32.mrf.mxu0  ;;  %v2114_v38 = vpop.f32.mrf.mxu1 }
 0x140   : > { %v967_v39 = vadd.f32 %v966_v36, %v618_v31  ;;  %v1035_v42 = vadd.f32 %v1034_v35, %v1004_v33  ;;  %v1421_v43 = vpack.c.bf16 %v1533_v37, %v1532_v22  ;;  %v1461_v46 = vpack.c.bf16 %v2114_v38, %v2108_v24 }
 0x141   : > { %v621_v44 = vpop.f32.mrf.mxu0  ;;  %v2120_v47 = vpop.f32.mrf.mxu1  ;;  %v1008_v58 = vmul.f32 %v1533_v37, %v1533_v37 }
 0x142   : > { %v1036_v48 = vadd.f32 %v1035_v42, %v1005_v41  ;;  %1469 = vst [vmem:[%s2070_s22 + $0x38] sm:$0xff] %v1421_v43   ;;  %v1416_v49 = vpack.c.bf16 %v621_v44, %v618_v31  ;;  %v968_v51 = vadd.f32 %v967_v39, %v621_v44  ;;  %v1006_v52 = vmul.f32 %v621_v44, %v621_v44 }
 0x143   : > { %1477 = vst [vmem:[%s2070_s22 + $0x78] sm:$0xff] %v1461_v46   ;;  %v1456_v53 = vpack.c.bf16 %v2120_v47, %v2112_v32 }
 0x144   : > { %1468 = vst [vmem:[%s2070_s22 + $0x30] sm:$0xff] %v1416_v49   ;;  %v969_v55 = vadd.f32 %v1532_v22, %v968_v51  ;;  %v1037_v56 = vadd.f32 %v1036_v48, %v1006_v52 }
 0x145   : > { %1476 = vst [vmem:[%s2070_s22 + $0x70] sm:$0xff] %v1456_v53  }
 0x146   : > { %v970_v59 = vadd.f32 %v1533_v37, %v969_v55  ;;  %v1038_v60 = vadd.f32 %v1037_v56, %v1007_v54 }
 0x147   : > { %1744 = shalt.err (!%p1741_p2)
}
 0x148   : > { %s1745_s14 = scalar_lea.hbm %s2126_s7, 2048  ;;  %s1749_s30 = scalar_lea.hbm %s2298_s2, 4096 }
 0x149   : > { %p1746_p6 = scmp.ne.s32.totalorder %s2126_s7, %s1745_s14  ;;  %p1750_p11 = scmp.lt.s32.totalorder %s2126_s7, %s2298_s2 }
 0x14a   : > { %p1751_p1 = scmp.lt.s32.totalorder %s1749_s30, %s1745_s14 }
 0x14b   : > { %p1747_p9 = pnand %p1746_p6, %p1995_p0 }
 0x14c   : > { %p1752_p8 = por %p1751_p1, %p1750_p11 }
 0x14d   : > { %p1748_p13 = pneg %p1747_p9 }
 0x14f   : > { %p1753_p4 = pnand %p1752_p8, %p1748_p13 }
 0x151   : > { %1756 = shalt.err (!%p1753_p4)
}
 0x152   : > { %s1878_s5 = smov 64   ;;  %s1879_s6 = smov 4   ;;  %v1009_v61 = vmul.f32 %v2060_v27, %v2060_v27  ;;  %v1039_v62 = vadd.f32 %v1038_v60, %v1008_v58  ;;  %v971_v63 = vadd.f32 %v970_v59, %v2060_v27  ;;  %v1010_v2 = vmul.f32 %v2066_v34, %v2066_v34 }
 0x153   : > { %1572 = dma.vmem_to_hbm [thread:$0]  (%p1995_p0), %s2128_s25, 2048, %s2126_s7, %s1065_s8, %s1878_s5, %s1878_s5, %s1879_s6   ;;  %v1011_v4 = vmul.f32 %v2058_v25, %v2058_v25  ;;  %v1012_v8 = vmul.f32 %v2062_v29, %v2062_v29  ;;  %v1013_v12 = vmul.f32 %v2080_v45, %v2080_v45  ;;  %v1014_v15 = vmul.f32 %v2086_v57, %v2086_v57 }
 0x154   : > { %v972_v1 = vadd.f32 %v971_v63, %v2066_v34  ;;  %v1040_v3 = vadd.f32 %v1039_v62, %v1009_v61  ;;  %v1017_v21 = vmul.f32 %v2096_v5, %v2096_v5  ;;  %v1018_v26 = vmul.f32 %v2102_v17, %v2102_v17  ;;  %s1282_s25 = sshll.u32 %s2026_s13, 3  ;;  %s1069_s7 = sand.u32 1, %s1938_s21  }
 0x155   : > { %v1021_v35 = vmul.f32 %v2112_v32, %v2112_v32  ;;  %v1023_v39 = vmul.f32 %v2108_v24, %v2108_v24  ;;  %v1024_v42 = vmul.f32 %v2114_v38, %v2114_v38  ;;  %s1345_s8 = sshll.u32 %s1863_s18, 7  ;;  %s264_s12 = scalar_lea.vmem [#allocation9], %s1282_s25 }
 0x156   : > { %v973_v6 = vadd.f32 %v2058_v25, %v972_v1  ;;  %v1041_v7 = vadd.f32 %v1040_v3, %v1010_v2  ;;  %v1015_v25 = vmul.f32 %v2076_v40, %v2076_v40  ;;  %s1104_s9 = sshll.u32 %s264_s12, 4  ;;  %s2209_s27 = scalar_lea.vmem [#allocation11], %s1282_s25  ;;  %s2217_s9 = int_to_ptr.vmem [resolvable:$true] %s1104_s9 }
 0x157   : > { %s1117_s10 = sshll.u32 %s2209_s27, 4  ;;  %s2215_s1 = scalar_lea.hbm %s2299_s3, %s1345_s8  ;;  %s2224_s10 = int_to_ptr.vmem [resolvable:$true] %s1117_s10 }
 0x158   : > { %v1042_v9 = vadd.f32 %v1041_v7, %v1011_v4  ;;  %v974_v11 = vadd.f32 %v2062_v29, %v973_v6  ;;  %v1016_v29 = vmul.f32 %v2082_v50, %v2082_v50  ;;  %s2222_s28 = scalar_lea.hbm %s2300_s4, %s1345_s8  ;;  %s2226_s30 = scalar_lea.sflag [#allocation10], %s1069_s7 }
 0x159   : > { %s1757_s22 = scalar_lea.vmem %s2217_s9, 128  ;;  %s1880_s23 = smov [#allocation9]  }
 0x15a   : > { %v975_v27 = vadd.f32 %v974_v11, %v2080_v45  ;;  %v1043_v13 = vadd.f32 %v1042_v9, %v1012_v8  ;;  %p1758_p10 = scmp.ne.s32.totalorder %s2217_s9, %s1757_s22  ;;  %s1761_s5 = sshll.u32 %s1880_s23, 4  ;;  %s1762_s5 = int_to_ptr.vmem [resolvable:$false] %s1761_s5 }
 0x15b   : > { %s1763_s6 = scalar_lea.vmem %s1762_s5, 256  ;;  %p1764_p5 = scmp.lt.s32.totalorder %s2217_s9, %s1762_s5 }
 0x15c   : > { %v1044_v34 = vadd.f32 %v1043_v13, %v1013_v12  ;;  %v976_v14 = vadd.f32 %v975_v27, %v2086_v57  ;;  %p1759_p12 = pnand %p1758_p10, %p1995_p0  ;;  %p1765_p7 = scmp.lt.s32.totalorder %s1763_s6, %s1757_s22 }
 0x15e   : > { %v977_v16 = vadd.f32 %v2076_v40, %v976_v14  ;;  %v1045_v18 = vadd.f32 %v1044_v34, %v1014_v15  ;;  %v1019_v40 = vmul.f32 %v2092_v0, %v2092_v0  ;;  %p1760_p3 = pneg %p1759_p12  ;;  %p1766_p2 = por %p1765_p7, %p1764_p5 }
 0x160   : > { %v1046_v19 = vadd.f32 %v1045_v18, %v1015_v25  ;;  %v978_v20 = vadd.f32 %v2082_v50, %v977_v16  ;;  %v1020_v50 = vmul.f32 %v2098_v10, %v2098_v10  ;;  %p1767_p6 = pnand %p1766_p2, %p1760_p3 }
 0x162   : > { %v979_v45 = vadd.f32 %v978_v20, %v2096_v5  ;;  %v1047_v22 = vadd.f32 %v1046_v19, %v1016_v29 }
 0x164   : > { %v1048_v23 = vadd.f32 %v1047_v22, %v1017_v21  ;;  %v980_v57 = vadd.f32 %v979_v45, %v2102_v17 }
 0x166   : > { %v981_v28 = vadd.f32 %v2092_v0, %v980_v57  ;;  %v1049_v30 = vadd.f32 %v1048_v23, %v1018_v26  ;;  %v1022_v0 = vmul.f32 %v2120_v47, %v2120_v47 }
 0x168   : > { %v1050_v31 = vadd.f32 %v1049_v30, %v1019_v40  ;;  %v982_v5 = vadd.f32 %v2098_v10, %v981_v28 }
 0x16a   : > { %v983_v33 = vadd.f32 %v982_v5, %v2112_v32  ;;  %v1051_v36 = vadd.f32 %v1050_v31, %v1020_v50 }
 0x16c   : > { %v1052_v17 = vadd.f32 %v1051_v36, %v1021_v35  ;;  %v984_v37 = vadd.f32 %v983_v33, %v2120_v47 }
 0x16e   : > { %v985_v41 = vadd.f32 %v2108_v24, %v984_v37  ;;  %v1053_v10 = vadd.f32 %v1052_v17, %v1022_v0 }
 0x170   : > { %v986_v32 = vadd.f32 %v2114_v38, %v985_v41  ;;  %v1054_v43 = vadd.f32 %v1053_v10, %v1023_v39 }
 0x172   : > { %v987_v44 = vrot.slane %v986_v32, 4  ;;  %v1055_v46 = vadd.f32 %v1054_v43, %v1024_v42 }
 0x174   : > { %v988_v48 = vadd.f32 %v987_v44, %v986_v32  ;;  %v1056_v49 = vrot.slane %v1055_v46, 4 }
 0x176   : > { %v989_v47 = vrot.slane %v988_v48, 2  ;;  %v1057_v51 = vadd.f32 %v1056_v49, %v1055_v46 }
 0x178   : > { %v990_v52 = vadd.f32 %v989_v47, %v988_v48  ;;  %v1058_v53 = vrot.slane %v1057_v51, 2 }
 0x17a   : > { %v991_v24 = vrot.slane %v990_v52, 1  ;;  %v1059_v54 = vadd.f32 %v1058_v53, %v1057_v51 }
 0x17c   : > { %v1060_v38 = vrot.slane %v1059_v54, 1  ;;  %v992_v55 = vadd.f32 %v991_v24, %v990_v52 }
 0x17e   : > { %1062 = vst [vmem:[%s264_s12] sm:$0xff] %v992_v55  ;;  %v1061_v56 = vadd.f32 %v1060_v38, %v1059_v54 }
 0x17f   : > { %1770 = shalt.err (!%p1767_p6)
}
 0x180   : > { %s1771_s25 = scalar_lea.hbm %s2215_s1, 128  ;;  %s1775_s12 = scalar_lea.hbm %s2299_s3, 256 }
 0x181   : > { %p1772_p9 = scmp.ne.s32.totalorder %s2215_s1, %s1771_s25  ;;  %p1776_p1 = scmp.lt.s32.totalorder %s2215_s1, %s2299_s3 }
 0x182   : > { %p1777_p8 = scmp.lt.s32.totalorder %s1775_s12, %s1771_s25 }
 0x183   : > { %p1773_p13 = pnand %p1772_p9, %p1995_p0 }
 0x184   : > { %p1778_p4 = por %p1777_p8, %p1776_p1 }
 0x185   : > { %p1774_p11 = pneg %p1773_p13 }
 0x187   : > { %p1779_p10 = pnand %p1778_p4, %p1774_p11 }
 0x189   : > { %1782 = shalt.err (!%p1779_p10)
}
 0x18a   : > { %1573 = dma.vmem_to_hbm [thread:$0]  (%p1995_p0), %s2217_s9, 128, %s2215_s1, %s2226_s30   ;;  %1063 = vst [vmem:[%s2209_s27] sm:$0xff] %v1061_v56 }
 0x18b   : > { %s1783_s18 = scalar_lea.vmem %s2224_s10, 128  ;;  %s1881_s21 = smov [#allocation11]  }
 0x18c   : > { %p1784_p12 = scmp.ne.s32.totalorder %s2224_s10, %s1783_s18  ;;  %s1787_s22 = sshll.u32 %s1881_s21, 4  ;;  %s1788_s22 = int_to_ptr.vmem [resolvable:$false] %s1787_s22 }
 0x18d   : > { %s1789_s23 = scalar_lea.vmem %s1788_s22, 256  ;;  %p1790_p7 = scmp.lt.s32.totalorder %s2224_s10, %s1788_s22 }
 0x18e   : > { %p1785_p3 = pnand %p1784_p12, %p1995_p0  ;;  %p1791_p2 = scmp.lt.s32.totalorder %s1789_s23, %s1783_s18 }
 0x190   : > { %p1786_p5 = pneg %p1785_p3  ;;  %p1792_p6 = por %p1791_p2, %p1790_p7 }
 0x192   : > { %p1793_p9 = pnand %p1792_p6, %p1786_p5 }
 0x194   : > { %1796 = shalt.err (!%p1793_p9)
}
 0x195   : > { %s1797_s9 = scalar_lea.hbm %s2222_s28, 128  ;;  %s1801_s5 = scalar_lea.hbm %s2300_s4, 256 }
 0x196   : > { %p1798_p13 = scmp.ne.s32.totalorder %s2222_s28, %s1797_s9  ;;  %p1802_p8 = scmp.lt.s32.totalorder %s2222_s28, %s2300_s4 }
 0x197   : > { %p1803_p4 = scmp.lt.s32.totalorder %s1801_s5, %s1797_s9 }
 0x198   : > { %p1799_p11 = pnand %p1798_p13, %p1995_p0 }
 0x199   : > { %p1804_p10 = por %p1803_p4, %p1802_p8 }
 0x19a   : > { %p1800_p1 = pneg %p1799_p11 }
 0x19c   : > { %p1805_p12 = pnand %p1804_p10, %p1800_p1 }
 0x19e   : > { %1808 = shalt.err (!%p1805_p12)
}
 0x19f   : > { %1574 = dma.vmem_to_hbm [thread:$0]  (%p1995_p0), %s2224_s10, 128, %s2222_s28, %s2226_s30  }
 0x1a0 PF: > { %s1129_s7 = sand.u32 1, %s1851_s15   ;;  %p2319_p3 = scmp.ne.s32.totalorder %s2307_s24, 0 }
 0x1a1   : > { %p2320_p5 = scmp.ge.s32.totalorder %s1871_s20, 2  ;;  %s1130_s8 = scalar_lea.sflag [#allocation5], %s1129_s7 }
 0x1a3   : > { %p1587_p7 = pnand %p2320_p5, %p2319_p3 }
 0x1a5   : > { %p1588_p2 = pneg %p1587_p7 }
 0x1a7   : > { %1842 = dma.done.wait (%p1588_p2), %s1130_s8, 2048  }
 0x1a8   : > { %1844 = vsyncadd (%p1588_p2), %s1130_s8, 4294965248  ;;  %s2321_s12 = sadd.s32 4294967294, %s1871_s20  }
 0x1a9   : > { %s1138_s13 = sand.u32 1, %s2321_s12  }
 0x1aa   : > { %s1139_s11 = scalar_lea.sflag [#allocation10], %s1138_s13 }
 0x1ab   : > { %1846 = dma.done.wait (%p1588_p2), %s1139_s11, 256  }
 0x1ac   : > { %1848 = vsyncadd (%p1588_p2), %s1139_s11, 4294967040  ;;  %s25_s20 = sadd.s32 1, %s1871_s20   ;;  %s2322_s15 = smov %s1855_s16 }
 0x1ad   : > { %p22_p0 = scmp.ge.s32.totalorder %s25_s20, 4   ;;  %s2323_s16 = smov %s1859_s17 }
 0x1ae   : > { %s2324_s17 = smov %s2004_s26  ;;  %s2325_s18 = smov %s1867_s19 }
 0x1af   : > { %s2326_s19 = smov %s2328_s29  ;;  %24 = sbr.rel (!%p22_p0) target bundleno = 11 (0xb), region = 118 }
 0x1b4   :  { %1153 = vsyncpa [#allocation4], 1 }
 0x1b5   :  { %1155 = vsyncpa [#allocation4 + $0x1], 1 }
 0x1b6   :  { %1156 = vsyncpa [#allocation7], 1 }
 0x1b7   :  { %1157 = vsyncpa [#allocation5], 1 }
 0x1b8   :  { %1159 = vsyncpa [#allocation5 + $0x1], 1 }
 0x1b9   :  { %1160 = vsyncpa [#allocation10], 1 }
 0x1ba   :  { %1162 = vsyncpa [#allocation10 + $0x1], 1 }

</bundles_post_ra>
